<compile_context>
chip_gen: v5e
topology: v5e:2x2
jax: 0.10.0
libtpu: 0.0.40
codegen_flags: <defaults>
</compile_context>

<pallas_src>
import functools

import jax
import jax.numpy as jnp
from jax import lax
from jax.experimental import pallas as pl
from jax.experimental.pallas import tpu as pltpu

F32 = jnp.float32


def _round_up(x, m):
    return ((x + m - 1) // m) * m


# ---------------------------------------------------------------------------
# One-time packing of all call-invariant parameters (review: hoist relayouts)
# ---------------------------------------------------------------------------
def pack_static_params(params, pre_weights):
    """Pack hyper2KernelW_i / pre_weights / contextChangeW / contextChangeB into
    one VMEM slab, pre-laid-out for the fused kernel.

    Slab shape: (n_ctx + 1, Cout*OBLK + n_ctx), f32
      rows 0..n_ctx-1 : [ hyper2KernelW_i (tap-major, per-o 128-aligned) | contextChangeW ]
      row  n_ctx      : [ pre_weights     (same layout)                  | contextChangeB ]
    Conv-weight column j of output channel o lives at lane o*OBLK + j, where
    j = (kh*K + kw)*Cin + ci (tap-major).  This matches the im2col row order
    built inside the kernel, and the 128-aligned o-blocks let the kernel pick
    each output channel's columns with aligned lane slices (no reshape).
    """
    c_out, c_in, ksz, _ = pre_weights.shape
    kk = ksz * ksz
    kkc = kk * c_in
    n_ctx = params["contextChangeW"].shape[0]
    oblk = _round_up(kkc, 128)

    hw = (params["hyper2KernelW_i"].astype(F32)
          .reshape(n_ctx, c_out, c_in, kk)        # [c, o, i, t]  (PyTorch flatten order)
          .transpose(0, 1, 3, 2)                  # [c, o, t, i]  -> j = t*Cin + i
          .reshape(n_ctx, c_out, kkc))
    hw = jnp.pad(hw, ((0, 0), (0, 0), (0, oblk - kkc))).reshape(n_ctx, c_out * oblk)

    pre = (pre_weights.astype(F32)
           .reshape(c_out, c_in, kk)
           .transpose(0, 2, 1)
           .reshape(c_out, kkc))
    pre = jnp.pad(pre, ((0, 0), (0, oblk - kkc))).reshape(1, c_out * oblk)

    cw = params["contextChangeW"].astype(F32)                    # (n_ctx, n_ctx)
    cb = params["contextChangeB"].astype(F32).reshape(1, n_ctx)

    top = jnp.concatenate([hw, cw], axis=1)                      # (n_ctx, Cout*OBLK + n_ctx)
    bot = jnp.concatenate([pre, cb], axis=1)                     # (1,     Cout*OBLK + n_ctx)
    return jnp.concatenate([top, bot], axis=0)                   # (n_ctx+1, ...)


# ---------------------------------------------------------------------------
# Fused kernel: one hyper/context MXU dot + in-kernel im2col + one conv GEMM
# ---------------------------------------------------------------------------
def _make_fused_kernel(n_batch, c_in, c_out, ksz, n_ctx, h, w, padding, oblk):
    kk = ksz * ksz
    kkc = kk * c_in
    hw_sp = h * w              # stride-1 "same" conv: Hout*Wout == H*W

    def kernel(ctx_ref,        # VMEM (1, n_ctx)                     context
               slab_ref,       # VMEM (n_ctx+1, c_out*oblk + n_ctx)  packed params
               x_ref,          # VMEM (n_batch*c_in, h*w)            flattened NCHW input
               out_ref,        # VMEM (n_batch*c_out, h*w)           lane-dense output
               nctx_ref,       # VMEM (1, n_ctx)                     new context
               rhs_ref,        # VMEM scratch (kkc, n_batch*h*w)     im2col patches
               ker_ref):       # VMEM scratch (c_out, kkc)           generated conv weight
        # ---- 1. hyper-net conv weight + context update: ONE tiny MXU dot ----
        #    big = ctx @ [hyperW | contextChangeW] + [pre_weights | contextChangeB]
        big = (jnp.dot(ctx_ref[...], slab_ref[:n_ctx, :],
                       preferred_element_type=jnp.float32)
               + slab_ref[n_ctx:n_ctx + 1, :])                  # (1, c_out*oblk + n_ctx)
        nctx_ref[...] = big[:, c_out * oblk:c_out * oblk + n_ctx]
        for o in range(c_out):                                  # aligned 128-lane picks
            ker_ref[o:o + 1, :] = big[:, o * oblk:o * oblk + kkc]

        # ---- 2. in-kernel im2col: K*K static lane-rolls + boundary masks ----
        # For output pixel m = hy*W + wx and tap (kh, kw) the source value is
        # x_flat[row, m + s] with s = (kh - p)*W + (kw - p).  Taps that fall in
        # the zero padding are masked: top/bottom rows via the flat-index range
        # check, left/right columns via the periodic wx check.
        x = x_ref[...]                                          # (N*Cin, H*W)
        m_idx = lax.broadcasted_iota(jnp.int32, (1, hw_sp), 1)
        if (w & (w - 1)) == 0:
            wx_idx = jnp.bitwise_and(m_idx, w - 1)
        else:
            wx_idx = lax.rem(m_idx, w)  # TODO(synk): non-power-of-two W path untested
        for t in range(kk):
            kh, kw = t // ksz, t % ksz
            s = (kh - padding) * w + (kw - padding)
            v = x if s == 0 else pltpu.roll(x, (-s) % hw_sp, 1)
            conds = []
            lo_w = padding - kw
            hi_w = w - 1 + padding - kw
            if lo_w > 0:
                conds.append(wx_idx >= lo_w)
            if hi_w < w - 1:
                conds.append(wx_idx <= hi_w)
            if s < 0:
                conds.append(m_idx >= -s)
            if s > 0:
                conds.append(m_idx <= hw_sp - 1 - s)
            if conds:
                mask = conds[0]
                for c in conds[1:]:
                    mask = jnp.logical_and(mask, c)
                v = jnp.where(mask, v, 0.0)
            for n in range(n_batch):                            # batch folded onto lanes
                rhs_ref[t * c_in:(t + 1) * c_in,
                        n * hw_sp:(n + 1) * hw_sp] = v[n * c_in:(n + 1) * c_in, :]

        # ---- 3. the conv: ONE im2col GEMM on the MXU -------------------------
        res = jnp.dot(ker_ref[...], rhs_ref[...],
                      preferred_element_type=jnp.float32)       # (Cout, N*H*W)
        for n in range(n_batch):                                # (N*Cout, H*W): free NCHW
            out_ref[n * c_out:(n + 1) * c_out, :] = res[:, n * hw_sp:(n + 1) * hw_sp]

    return kernel


# ---------------------------------------------------------------------------
# Full forward (mirrors BatchConv2dContext.forward)
# ---------------------------------------------------------------------------
def batch_conv2d_context_forward(layer, context, packed_params, *,
                                 out_channel, kernel_size, stride, padding):
    """Returns (conv_out, new_context).  `packed_params` is the slab produced
    once by pack_static_params (static relayouts hoisted out of the per-call
    jitted path, per the performance review)."""
    n_batch, c_in, h_in, w_in = layer.shape
    n_ctx = context.shape[-1]
    kk = kernel_size * kernel_size
    kkc = kk * c_in
    oblk = _round_up(kkc, 128)
    h_out = (h_in + 2 * padding - kernel_size) // stride + 1
    w_out = (w_in + 2 * padding - kernel_size) // stride + 1

    # The in-kernel roll-based im2col assumes a stride-1 "same" convolution
    # (flat source index = output index + per-tap constant).
    # TODO(synk): general stride/padding needs a wrapper-side or gather-based
    # im2col path; not needed for this module configuration.
    assert stride == 1 and h_out == h_in and w_out == w_in, (
        "fused kernel supports stride=1 'same' convolutions only")
    assert packed_params.shape == (n_ctx + 1, out_channel * oblk + n_ctx), (
        packed_params.shape)

    hw_sp = h_out * w_out
    # NOTE: for configs with Hout*Wout < 128, fold N onto the output lane axis
    # instead to keep the store path lane-dense (review caveat); 16x16 -> 256.

    x_flat = layer.astype(F32).reshape(n_batch * c_in, h_in * w_in)   # free bitcast
    ctx_v = context.astype(F32).reshape(1, n_ctx)                     # free

    flops = (2 * out_channel * kkc * n_batch * hw_sp
             + 2 * n_ctx * packed_params.shape[1])
    bytes_accessed = 4 * (x_flat.size + packed_params.size + ctx_v.size
                          + n_batch * out_channel * hw_sp + n_ctx)

    vmem = pl.BlockSpec(memory_space=pltpu.MemorySpace.VMEM)
    out_flat, new_ctx = pl.pallas_call(
        _make_fused_kernel(n_batch, c_in, out_channel, kernel_size, n_ctx,
                           h_in, w_in, padding, oblk),
        out_shape=(
            jax.ShapeDtypeStruct((n_batch * out_channel, hw_sp), F32),
            jax.ShapeDtypeStruct((1, n_ctx), F32),
        ),
        in_specs=[vmem, vmem, vmem],
        out_specs=(vmem, vmem),
        scratch_shapes=[
            pltpu.VMEM((kkc, n_batch * hw_sp), F32),     # im2col patch matrix
            pltpu.VMEM((out_channel, kkc), F32),         # generated conv weight
        ],
        cost_estimate=pl.CostEstimate(flops=flops, transcendentals=0,
                                      bytes_accessed=bytes_accessed),
    )(ctx_v, packed_params, x_flat)

    out = out_flat.reshape(n_batch, out_channel, h_out, w_out)        # free
    return out, new_ctx.reshape(n_ctx)


if __name__ == "__main__":
    in_channel, out_channel, kernel_size = 4, 4, 3
    stride, padding, bias = 1, 1, False
    N, H, W = 2, 16, 16
    ksize = in_channel * out_channel * kernel_size * kernel_size

    key = jax.random.PRNGKey(0)
    k1, k2, k3, k4, k5, k6 = jax.random.split(key, 6)

    # The PyTorch module initializes hyper2KernelW_i to fmod(zeros, 2) == 0,
    # which would hide the hyper-network path from the numeric check -- use a
    # small nonzero weight here so that path is actually validated.
    params = {
        "hyper2KernelW_i": 0.05 * jax.random.normal(k1, (16, ksize), jnp.float32),
        "hyper2KernelB_i": jnp.zeros((ksize,), jnp.float32),
        "contextChangeW": jnp.fmod(jax.random.normal(k2, (16, 16), jnp.float32), 2.0),
        "contextChangeB": jnp.fmod(jax.random.normal(k3, (16,), jnp.float32), 2.0),
    }
    # TODO(synk): `bias` and hyper2KernelB_i are stored by the PyTorch module
    # but never used in its forward(); they are intentionally unused here too.

    layer = jax.random.normal(k4, (N, in_channel, H, W), jnp.float32)
    context = jax.random.normal(k5, (16,), jnp.float32)
    pre_weights = 0.1 * jax.random.normal(
        k6, (out_channel, in_channel, kernel_size, kernel_size), jnp.float32)

    # One-time packing of all call-invariant parameters (hoisted out of the
    # per-call jitted path).  If pre_weights changed per call, this tiny pack
    # could be folded back into the jitted forward at negligible cost.
    slab = jax.block_until_ready(pack_static_params(params, pre_weights))

    fwd = jax.jit(functools.partial(
        batch_conv2d_context_forward,
        out_channel=out_channel, kernel_size=kernel_size,
        stride=stride, padding=padding))
    out, new_ctx = fwd(layer, context, slab)
    out, new_ctx = jax.block_until_ready((out, new_ctx))

    # Pure-JAX reference check
    kernel_ref = (context @ params["hyper2KernelW_i"]).reshape(
        out_channel, in_channel, kernel_size, kernel_size) + pre_weights
    ref_out = jax.lax.conv_general_dilated(
        layer, kernel_ref,
        window_strides=(stride, stride),
        padding=((padding, padding), (padding, padding)),
        dimension_numbers=("NCHW", "OIHW", "NCHW"))
    ref_ctx = context @ params["contextChangeW"] + params["contextChangeB"]

    assert out.shape == (N, out_channel, H, W), out.shape
    assert new_ctx.shape == (16,), new_ctx.shape
    assert jnp.allclose(out, ref_out, atol=1e-3, rtol=1e-3), \
        float(jnp.max(jnp.abs(out - ref_out)))
    assert jnp.allclose(new_ctx, ref_ctx, atol=1e-3, rtol=1e-3)

    print("KERNEL_OK")
</pallas_src>

<mosaic_0001>
module attributes {stable_mosaic.version = 11 : i64} {
  func.func @kernel(%arg0: memref<1x16xf32, #tpu.memory_space<vmem>>, %arg1: memref<17x528xf32, #tpu.memory_space<vmem>>, %arg2: memref<8x256xf32, #tpu.memory_space<vmem>>, %arg3: memref<8x256xf32, #tpu.memory_space<vmem>>, %arg4: memref<1x16xf32, #tpu.memory_space<vmem>>, %arg5: memref<36x512xf32, #tpu.memory_space<vmem>>, %arg6: memref<4x36xf32, #tpu.memory_space<vmem>>) attributes {dimension_semantics = [], scalar_prefetch = 0 : i64, scratch_operands = 2 : i64, tpu.core_type = #tpu.core_type<tc>} {
    %c0 = arith.constant 0 : index
    %c0_0 = arith.constant 0 : index
    %0 = vector.load %arg0[%c0, %c0_0] : memref<1x16xf32, #tpu.memory_space<vmem>>, vector<1x16xf32>
    %c0_1 = arith.constant 0 : index
    %c0_2 = arith.constant 0 : index
    %1 = vector.load %arg1[%c0_1, %c0_2] : memref<17x528xf32, #tpu.memory_space<vmem>>, vector<16x528xf32>
    %cst = arith.constant dense<0.000000e+00> : vector<1x528xf32>
    %2 = tpu.matmul %0, %1, %cst {dimension_numbers = #tpu.dot_dimension_numbers<[1], [0], [0], [1], [0, 0, 1, 1], [], []>} : vector<1x16xf32>, vector<16x528xf32>, vector<1x528xf32> -> vector<1x528xf32>
    %c16 = arith.constant 16 : index
    %c0_3 = arith.constant 0 : index
    %3 = vector.load %arg1[%c16, %c0_3] : memref<17x528xf32, #tpu.memory_space<vmem>>, vector<1x528xf32>
    %4 = arith.addf %2, %3 : vector<1x528xf32>
    %5 = vector.extract_strided_slice %4 {offsets = [0, 512], sizes = [1, 16], strides = [1, 1]} : vector<1x528xf32> to vector<1x16xf32>
    %c0_4 = arith.constant 0 : index
    %c0_5 = arith.constant 0 : index
    %6 = vector.load %arg4[%c0_4, %c0_5] : memref<1x16xf32, #tpu.memory_space<vmem>>, vector<1x16xf32>
    tpu.vector_store %arg4[%c0_4, %c0_5], %5 {strides = array<i32>} : memref<1x16xf32, #tpu.memory_space<vmem>>, vector<1x16xf32>,
    %7 = vector.extract_strided_slice %4 {offsets = [0, 0], sizes = [1, 36], strides = [1, 1]} : vector<1x528xf32> to vector<1x36xf32>
    %c0_6 = arith.constant 0 : index
    %c0_7 = arith.constant 0 : index
    %8 = vector.load %arg6[%c0_6, %c0_7] : memref<4x36xf32, #tpu.memory_space<vmem>>, vector<1x36xf32>
    tpu.vector_store %arg6[%c0_6, %c0_7], %7 {strides = array<i32>} : memref<4x36xf32, #tpu.memory_space<vmem>>, vector<1x36xf32>,
    %9 = vector.extract_strided_slice %4 {offsets = [0, 128], sizes = [1, 36], strides = [1, 1]} : vector<1x528xf32> to vector<1x36xf32>
    %c1 = arith.constant 1 : index
    %c0_8 = arith.constant 0 : index
    %10 = vector.load %arg6[%c1, %c0_8] : memref<4x36xf32, #tpu.memory_space<vmem>>, vector<1x36xf32>
    tpu.vector_store %arg6[%c1, %c0_8], %9 {strides = array<i32>} : memref<4x36xf32, #tpu.memory_space<vmem>>, vector<1x36xf32>,
    %11 = vector.extract_strided_slice %4 {offsets = [0, 256], sizes = [1, 36], strides = [1, 1]} : vector<1x528xf32> to vector<1x36xf32>
    %c2 = arith.constant 2 : index
    %c0_9 = arith.constant 0 : index
    %12 = vector.load %arg6[%c2, %c0_9] : memref<4x36xf32, #tpu.memory_space<vmem>>, vector<1x36xf32>
    tpu.vector_store %arg6[%c2, %c0_9], %11 {strides = array<i32>} : memref<4x36xf32, #tpu.memory_space<vmem>>, vector<1x36xf32>,
    %13 = vector.extract_strided_slice %4 {offsets = [0, 384], sizes = [1, 36], strides = [1, 1]} : vector<1x528xf32> to vector<1x36xf32>
    %c3 = arith.constant 3 : index
    %c0_10 = arith.constant 0 : index
    %14 = vector.load %arg6[%c3, %c0_10] : memref<4x36xf32, #tpu.memory_space<vmem>>, vector<1x36xf32>
    tpu.vector_store %arg6[%c3, %c0_10], %13 {strides = array<i32>} : memref<4x36xf32, #tpu.memory_space<vmem>>, vector<1x36xf32>,
    %c0_11 = arith.constant 0 : index
    %c0_12 = arith.constant 0 : index
    %15 = vector.load %arg2[%c0_11, %c0_12] : memref<8x256xf32, #tpu.memory_space<vmem>>, vector<8x256xf32>
    %16 = tpu.iota {dimensions = array<i32: 1>} : vector<1x256xi32>
    %c15_i32 = arith.constant 15 : i32
    %17 = vector.broadcast %c15_i32 : i32 to vector<1x256xi32>
    %18 = arith.andi %16, %17 : vector<1x256xi32>
    %c17_i32 = arith.constant 17 : i32
    %19 = tpu.dynamic_rotate %15 by %c17_i32 dim 1 : vector<8x256xf32>, i32 -> vector<8x256xf32>
    %c1_i32 = arith.constant 1 : i32
    %20 = vector.broadcast %c1_i32 : i32 to vector<1x256xi32>
    %21 = arith.cmpi sge, %18, %20 : vector<1x256xi32>
    %c17_i32_13 = arith.constant 17 : i32
    %22 = vector.broadcast %c17_i32_13 : i32 to vector<1x256xi32>
    %23 = arith.cmpi sge, %16, %22 : vector<1x256xi32>
    %24 = arith.andi %21, %23 : vector<1x256xi1>
    %cst_14 = arith.constant 0.000000e+00 : f32
    %25 = vector.shape_cast %24 : vector<1x256xi1> to vector<1x256xi1>
    %26 = vector.broadcast %25 : vector<1x256xi1> to vector<8x256xi1>
    %27 = vector.broadcast %cst_14 : f32 to vector<8x256xf32>
    %28 = arith.select %26, %19, %27 : vector<8x256xi1>, vector<8x256xf32>
    %29 = vector.extract_strided_slice %28 {offsets = [0, 0], sizes = [4, 256], strides = [1, 1]} : vector<8x256xf32> to vector<4x256xf32>
    %c0_15 = arith.constant 0 : index
    %c0_16 = arith.constant 0 : index
    %30 = vector.load %arg5[%c0_15, %c0_16] : memref<36x512xf32, #tpu.memory_space<vmem>>, vector<4x256xf32>
    tpu.vector_store %arg5[%c0_15, %c0_16], %29 {strides = array<i32>} : memref<36x512xf32, #tpu.memory_space<vmem>>, vector<4x256xf32>,
    %31 = vector.extract_strided_slice %28 {offsets = [4, 0], sizes = [4, 256], strides = [1, 1]} : vector<8x256xf32> to vector<4x256xf32>
    %c0_17 = arith.constant 0 : index
    %c256 = arith.constant 256 : index
    %32 = vector.load %arg5[%c0_17, %c256] : memref<36x512xf32, #tpu.memory_space<vmem>>, vector<4x256xf32>
    tpu.vector_store %arg5[%c0_17, %c256], %31 {strides = array<i32>} : memref<36x512xf32, #tpu.memory_space<vmem>>, vector<4x256xf32>,
    %c16_i32 = arith.constant 16 : i32
    %33 = tpu.dynamic_rotate %15 by %c16_i32 dim 1 : vector<8x256xf32>, i32 -> vector<8x256xf32>
    %c16_i32_18 = arith.constant 16 : i32
    %34 = vector.broadcast %c16_i32_18 : i32 to vector<1x256xi32>
    %35 = arith.cmpi sge, %16, %34 : vector<1x256xi32>
    %cst_19 = arith.constant 0.000000e+00 : f32
    %36 = vector.shape_cast %35 : vector<1x256xi1> to vector<1x256xi1>
    %37 = vector.broadcast %36 : vector<1x256xi1> to vector<8x256xi1>
    %38 = vector.broadcast %cst_19 : f32 to vector<8x256xf32>
    %39 = arith.select %37, %33, %38 : vector<8x256xi1>, vector<8x256xf32>
    %40 = vector.extract_strided_slice %39 {offsets = [0, 0], sizes = [4, 256], strides = [1, 1]} : vector<8x256xf32> to vector<4x256xf32>
    %c4 = arith.constant 4 : index
    %c0_20 = arith.constant 0 : index
    %41 = vector.load %arg5[%c4, %c0_20] : memref<36x512xf32, #tpu.memory_space<vmem>>, vector<4x256xf32>
    tpu.vector_store %arg5[%c4, %c0_20], %40 {strides = array<i32>} : memref<36x512xf32, #tpu.memory_space<vmem>>, vector<4x256xf32>,
    %42 = vector.extract_strided_slice %39 {offsets = [4, 0], sizes = [4, 256], strides = [1, 1]} : vector<8x256xf32> to vector<4x256xf32>
    %c4_21 = arith.constant 4 : index
    %c256_22 = arith.constant 256 : index
    %43 = vector.load %arg5[%c4_21, %c256_22] : memref<36x512xf32, #tpu.memory_space<vmem>>, vector<4x256xf32>
    tpu.vector_store %arg5[%c4_21, %c256_22], %42 {strides = array<i32>} : memref<36x512xf32, #tpu.memory_space<vmem>>, vector<4x256xf32>,
    %c15_i32_23 = arith.constant 15 : i32
    %44 = tpu.dynamic_rotate %15 by %c15_i32_23 dim 1 : vector<8x256xf32>, i32 -> vector<8x256xf32>
    %c14_i32 = arith.constant 14 : i32
    %45 = vector.broadcast %c14_i32 : i32 to vector<1x256xi32>
    %46 = arith.cmpi sle, %18, %45 : vector<1x256xi32>
    %c15_i32_24 = arith.constant 15 : i32
    %47 = vector.broadcast %c15_i32_24 : i32 to vector<1x256xi32>
    %48 = arith.cmpi sge, %16, %47 : vector<1x256xi32>
    %49 = arith.andi %46, %48 : vector<1x256xi1>
    %cst_25 = arith.constant 0.000000e+00 : f32
    %50 = vector.shape_cast %49 : vector<1x256xi1> to vector<1x256xi1>
    %51 = vector.broadcast %50 : vector<1x256xi1> to vector<8x256xi1>
    %52 = vector.broadcast %cst_25 : f32 to vector<8x256xf32>
    %53 = arith.select %51, %44, %52 : vector<8x256xi1>, vector<8x256xf32>
    %54 = vector.extract_strided_slice %53 {offsets = [0, 0], sizes = [4, 256], strides = [1, 1]} : vector<8x256xf32> to vector<4x256xf32>
    %c8 = arith.constant 8 : index
    %c0_26 = arith.constant 0 : index
    %55 = vector.load %arg5[%c8, %c0_26] : memref<36x512xf32, #tpu.memory_space<vmem>>, vector<4x256xf32>
    tpu.vector_store %arg5[%c8, %c0_26], %54 {strides = array<i32>} : memref<36x512xf32, #tpu.memory_space<vmem>>, vector<4x256xf32>,
    %56 = vector.extract_strided_slice %53 {offsets = [4, 0], sizes = [4, 256], strides = [1, 1]} : vector<8x256xf32> to vector<4x256xf32>
    %c8_27 = arith.constant 8 : index
    %c256_28 = arith.constant 256 : index
    %57 = vector.load %arg5[%c8_27, %c256_28] : memref<36x512xf32, #tpu.memory_space<vmem>>, vector<4x256xf32>
    tpu.vector_store %arg5[%c8_27, %c256_28], %56 {strides = array<i32>} : memref<36x512xf32, #tpu.memory_space<vmem>>, vector<4x256xf32>,
    %c1_i32_29 = arith.constant 1 : i32
    %58 = tpu.dynamic_rotate %15 by %c1_i32_29 dim 1 : vector<8x256xf32>, i32 -> vector<8x256xf32>
    %c1_i32_30 = arith.constant 1 : i32
    %59 = vector.broadcast %c1_i32_30 : i32 to vector<1x256xi32>
    %60 = arith.cmpi sge, %18, %59 : vector<1x256xi32>
    %c1_i32_31 = arith.constant 1 : i32
    %61 = vector.broadcast %c1_i32_31 : i32 to vector<1x256xi32>
    %62 = arith.cmpi sge, %16, %61 : vector<1x256xi32>
    %63 = arith.andi %60, %62 : vector<1x256xi1>
    %cst_32 = arith.constant 0.000000e+00 : f32
    %64 = vector.shape_cast %63 : vector<1x256xi1> to vector<1x256xi1>
    %65 = vector.broadcast %64 : vector<1x256xi1> to vector<8x256xi1>
    %66 = vector.broadcast %cst_32 : f32 to vector<8x256xf32>
    %67 = arith.select %65, %58, %66 : vector<8x256xi1>, vector<8x256xf32>
    %68 = vector.extract_strided_slice %67 {offsets = [0, 0], sizes = [4, 256], strides = [1, 1]} : vector<8x256xf32> to vector<4x256xf32>
    %c12 = arith.constant 12 : index
    %c0_33 = arith.constant 0 : index
    %69 = vector.load %arg5[%c12, %c0_33] : memref<36x512xf32, #tpu.memory_space<vmem>>, vector<4x256xf32>
    tpu.vector_store %arg5[%c12, %c0_33], %68 {strides = array<i32>} : memref<36x512xf32, #tpu.memory_space<vmem>>, vector<4x256xf32>,
    %70 = vector.extract_strided_slice %67 {offsets = [4, 0], sizes = [4, 256], strides = [1, 1]} : vector<8x256xf32> to vector<4x256xf32>
    %c12_34 = arith.constant 12 : index
    %c256_35 = arith.constant 256 : index
    %71 = vector.load %arg5[%c12_34, %c256_35] : memref<36x512xf32, #tpu.memory_space<vmem>>, vector<4x256xf32>
    tpu.vector_store %arg5[%c12_34, %c256_35], %70 {strides = array<i32>} : memref<36x512xf32, #tpu.memory_space<vmem>>, vector<4x256xf32>,
    %72 = vector.extract_strided_slice %15 {offsets = [0, 0], sizes = [4, 256], strides = [1, 1]} : vector<8x256xf32> to vector<4x256xf32>
    %c16_36 = arith.constant 16 : index
    %c0_37 = arith.constant 0 : index
    %73 = vector.load %arg5[%c16_36, %c0_37] : memref<36x512xf32, #tpu.memory_space<vmem>>, vector<4x256xf32>
    tpu.vector_store %arg5[%c16_36, %c0_37], %72 {strides = array<i32>} : memref<36x512xf32, #tpu.memory_space<vmem>>, vector<4x256xf32>,
    %74 = vector.extract_strided_slice %15 {offsets = [4, 0], sizes = [4, 256], strides = [1, 1]} : vector<8x256xf32> to vector<4x256xf32>
    %c16_38 = arith.constant 16 : index
    %c256_39 = arith.constant 256 : index
    %75 = vector.load %arg5[%c16_38, %c256_39] : memref<36x512xf32, #tpu.memory_space<vmem>>, vector<4x256xf32>
    tpu.vector_store %arg5[%c16_38, %c256_39], %74 {strides = array<i32>} : memref<36x512xf32, #tpu.memory_space<vmem>>, vector<4x256xf32>,
    %c255_i32 = arith.constant 255 : i32
    %76 = tpu.dynamic_rotate %15 by %c255_i32 dim 1 : vector<8x256xf32>, i32 -> vector<8x256xf32>
    %c14_i32_40 = arith.constant 14 : i32
    %77 = vector.broadcast %c14_i32_40 : i32 to vector<1x256xi32>
    %78 = arith.cmpi sle, %18, %77 : vector<1x256xi32>
    %c254_i32 = arith.constant 254 : i32
    %79 = vector.broadcast %c254_i32 : i32 to vector<1x256xi32>
    %80 = arith.cmpi sle, %16, %79 : vector<1x256xi32>
    %81 = arith.andi %78, %80 : vector<1x256xi1>
    %cst_41 = arith.constant 0.000000e+00 : f32
    %82 = vector.shape_cast %81 : vector<1x256xi1> to vector<1x256xi1>
    %83 = vector.broadcast %82 : vector<1x256xi1> to vector<8x256xi1>
    %84 = vector.broadcast %cst_41 : f32 to vector<8x256xf32>
    %85 = arith.select %83, %76, %84 : vector<8x256xi1>, vector<8x256xf32>
    %86 = vector.extract_strided_slice %85 {offsets = [0, 0], sizes = [4, 256], strides = [1, 1]} : vector<8x256xf32> to vector<4x256xf32>
    %c20 = arith.constant 20 : index
    %c0_42 = arith.constant 0 : index
    %87 = vector.load %arg5[%c20, %c0_42] : memref<36x512xf32, #tpu.memory_space<vmem>>, vector<4x256xf32>
    tpu.vector_store %arg5[%c20, %c0_42], %86 {strides = array<i32>} : memref<36x512xf32, #tpu.memory_space<vmem>>, vector<4x256xf32>,
    %88 = vector.extract_strided_slice %85 {offsets = [4, 0], sizes = [4, 256], strides = [1, 1]} : vector<8x256xf32> to vector<4x256xf32>
    %c20_43 = arith.constant 20 : index
    %c256_44 = arith.constant 256 : index
    %89 = vector.load %arg5[%c20_43, %c256_44] : memref<36x512xf32, #tpu.memory_space<vmem>>, vector<4x256xf32>
    tpu.vector_store %arg5[%c20_43, %c256_44], %88 {strides = array<i32>} : memref<36x512xf32, #tpu.memory_space<vmem>>, vector<4x256xf32>,
    %c241_i32 = arith.constant 241 : i32
    %90 = tpu.dynamic_rotate %15 by %c241_i32 dim 1 : vector<8x256xf32>, i32 -> vector<8x256xf32>
    %c1_i32_45 = arith.constant 1 : i32
    %91 = vector.broadcast %c1_i32_45 : i32 to vector<1x256xi32>
    %92 = arith.cmpi sge, %18, %91 : vector<1x256xi32>
    %c240_i32 = arith.constant 240 : i32
    %93 = vector.broadcast %c240_i32 : i32 to vector<1x256xi32>
    %94 = arith.cmpi sle, %16, %93 : vector<1x256xi32>
    %95 = arith.andi %92, %94 : vector<1x256xi1>
    %cst_46 = arith.constant 0.000000e+00 : f32
    %96 = vector.shape_cast %95 : vector<1x256xi1> to vector<1x256xi1>
    %97 = vector.broadcast %96 : vector<1x256xi1> to vector<8x256xi1>
    %98 = vector.broadcast %cst_46 : f32 to vector<8x256xf32>
    %99 = arith.select %97, %90, %98 : vector<8x256xi1>, vector<8x256xf32>
    %100 = vector.extract_strided_slice %99 {offsets = [0, 0], sizes = [4, 256], strides = [1, 1]} : vector<8x256xf32> to vector<4x256xf32>
    %c24 = arith.constant 24 : index
    %c0_47 = arith.constant 0 : index
    %101 = vector.load %arg5[%c24, %c0_47] : memref<36x512xf32, #tpu.memory_space<vmem>>, vector<4x256xf32>
    tpu.vector_store %arg5[%c24, %c0_47], %100 {strides = array<i32>} : memref<36x512xf32, #tpu.memory_space<vmem>>, vector<4x256xf32>,
    %102 = vector.extract_strided_slice %99 {offsets = [4, 0], sizes = [4, 256], strides = [1, 1]} : vector<8x256xf32> to vector<4x256xf32>
    %c24_48 = arith.constant 24 : index
    %c256_49 = arith.constant 256 : index
    %103 = vector.load %arg5[%c24_48, %c256_49] : memref<36x512xf32, #tpu.memory_space<vmem>>, vector<4x256xf32>
    tpu.vector_store %arg5[%c24_48, %c256_49], %102 {strides = array<i32>} : memref<36x512xf32, #tpu.memory_space<vmem>>, vector<4x256xf32>,
    %c240_i32_50 = arith.constant 240 : i32
    %104 = tpu.dynamic_rotate %15 by %c240_i32_50 dim 1 : vector<8x256xf32>, i32 -> vector<8x256xf32>
    %c239_i32 = arith.constant 239 : i32
    %105 = vector.broadcast %c239_i32 : i32 to vector<1x256xi32>
    %106 = arith.cmpi sle, %16, %105 : vector<1x256xi32>
    %cst_51 = arith.constant 0.000000e+00 : f32
    %107 = vector.shape_cast %106 : vector<1x256xi1> to vector<1x256xi1>
    %108 = vector.broadcast %107 : vector<1x256xi1> to vector<8x256xi1>
    %109 = vector.broadcast %cst_51 : f32 to vector<8x256xf32>
    %110 = arith.select %108, %104, %109 : vector<8x256xi1>, vector<8x256xf32>
    %111 = vector.extract_strided_slice %110 {offsets = [0, 0], sizes = [4, 256], strides = [1, 1]} : vector<8x256xf32> to vector<4x256xf32>
    %c28 = arith.constant 28 : index
    %c0_52 = arith.constant 0 : index
    %112 = vector.load %arg5[%c28, %c0_52] : memref<36x512xf32, #tpu.memory_space<vmem>>, vector<4x256xf32>
    tpu.vector_store %arg5[%c28, %c0_52], %111 {strides = array<i32>} : memref<36x512xf32, #tpu.memory_space<vmem>>, vector<4x256xf32>,
    %113 = vector.extract_strided_slice %110 {offsets = [4, 0], sizes = [4, 256], strides = [1, 1]} : vector<8x256xf32> to vector<4x256xf32>
    %c28_53 = arith.constant 28 : index
    %c256_54 = arith.constant 256 : index
    %114 = vector.load %arg5[%c28_53, %c256_54] : memref<36x512xf32, #tpu.memory_space<vmem>>, vector<4x256xf32>
    tpu.vector_store %arg5[%c28_53, %c256_54], %113 {strides = array<i32>} : memref<36x512xf32, #tpu.memory_space<vmem>>, vector<4x256xf32>,
    %c239_i32_55 = arith.constant 239 : i32
    %115 = tpu.dynamic_rotate %15 by %c239_i32_55 dim 1 : vector<8x256xf32>, i32 -> vector<8x256xf32>
    %c14_i32_56 = arith.constant 14 : i32
    %116 = vector.broadcast %c14_i32_56 : i32 to vector<1x256xi32>
    %117 = arith.cmpi sle, %18, %116 : vector<1x256xi32>
    %c238_i32 = arith.constant 238 : i32
    %118 = vector.broadcast %c238_i32 : i32 to vector<1x256xi32>
    %119 = arith.cmpi sle, %16, %118 : vector<1x256xi32>
    %120 = arith.andi %117, %119 : vector<1x256xi1>
    %cst_57 = arith.constant 0.000000e+00 : f32
    %121 = vector.shape_cast %120 : vector<1x256xi1> to vector<1x256xi1>
    %122 = vector.broadcast %121 : vector<1x256xi1> to vector<8x256xi1>
    %123 = vector.broadcast %cst_57 : f32 to vector<8x256xf32>
    %124 = arith.select %122, %115, %123 : vector<8x256xi1>, vector<8x256xf32>
    %125 = vector.extract_strided_slice %124 {offsets = [0, 0], sizes = [4, 256], strides = [1, 1]} : vector<8x256xf32> to vector<4x256xf32>
    %c32 = arith.constant 32 : index
    %c0_58 = arith.constant 0 : index
    %126 = vector.load %arg5[%c32, %c0_58] : memref<36x512xf32, #tpu.memory_space<vmem>>, vector<4x256xf32>
    tpu.vector_store %arg5[%c32, %c0_58], %125 {strides = array<i32>} : memref<36x512xf32, #tpu.memory_space<vmem>>, vector<4x256xf32>,
    %127 = vector.extract_strided_slice %124 {offsets = [4, 0], sizes = [4, 256], strides = [1, 1]} : vector<8x256xf32> to vector<4x256xf32>
    %c32_59 = arith.constant 32 : index
    %c256_60 = arith.constant 256 : index
    %128 = vector.load %arg5[%c32_59, %c256_60] : memref<36x512xf32, #tpu.memory_space<vmem>>, vector<4x256xf32>
    tpu.vector_store %arg5[%c32_59, %c256_60], %127 {strides = array<i32>} : memref<36x512xf32, #tpu.memory_space<vmem>>, vector<4x256xf32>,
    %c0_61 = arith.constant 0 : index
    %c0_62 = arith.constant 0 : index
    %129 = vector.load %arg6[%c0_61, %c0_62] : memref<4x36xf32, #tpu.memory_space<vmem>>, vector<4x36xf32>
    %c0_63 = arith.constant 0 : index
    %c0_64 = arith.constant 0 : index
    %130 = vector.load %arg5[%c0_63, %c0_64] : memref<36x512xf32, #tpu.memory_space<vmem>>, vector<36x512xf32>
    %cst_65 = arith.constant dense<0.000000e+00> : vector<4x512xf32>
    %131 = tpu.matmul %129, %130, %cst_65 {dimension_numbers = #tpu.dot_dimension_numbers<[1], [0], [0], [1], [0, 0, 1, 1], [], []>} : vector<4x36xf32>, vector<36x512xf32>, vector<4x512xf32> -> vector<4x512xf32>
    %132 = vector.extract_strided_slice %131 {offsets = [0, 0], sizes = [4, 256], strides = [1, 1]} : vector<4x512xf32> to vector<4x256xf32>
    %c0_66 = arith.constant 0 : index
    %c0_67 = arith.constant 0 : index
    %133 = vector.load %arg3[%c0_66, %c0_67] : memref<8x256xf32, #tpu.memory_space<vmem>>, vector<4x256xf32>
    tpu.vector_store %arg3[%c0_66, %c0_67], %132 {strides = array<i32>} : memref<8x256xf32, #tpu.memory_space<vmem>>, vector<4x256xf32>,
    %134 = vector.extract_strided_slice %131 {offsets = [0, 256], sizes = [4, 256], strides = [1, 1]} : vector<4x512xf32> to vector<4x256xf32>
    %c4_68 = arith.constant 4 : index
    %c0_69 = arith.constant 0 : index
    %135 = vector.load %arg3[%c4_68, %c0_69] : memref<8x256xf32, #tpu.memory_space<vmem>>, vector<4x256xf32>
    tpu.vector_store %arg3[%c4_68, %c0_69], %134 {strides = array<i32>} : memref<8x256xf32, #tpu.memory_space<vmem>>, vector<4x256xf32>,
    return
  }
}

</mosaic_0001>

<bundles_post_ra>
// kernel: batch_conv2d_context_forward.1
= control target key start
LH: loop header
LB: loop body
LE: loop exit
PB: predicated region body
PF: predicated region fallthrough
CT: control target
= control target key end

     0   :  { %s585_s21 = smov 113   ;;  %s586_s22 = smov 111   ;;  %vm43_vm0 = vcmask 130048   ;;  %s814_s0 = inlined_call_operand.vmem [shape: f32[1,16], index: 0, kind: input, shape index: {}]   ;;  %s815_s1 = inlined_call_operand.vmem [shape: f32[17,528], index: 1, kind: input, shape index: {}]   ;;  %s816_s2 = inlined_call_operand.vmem [shape: f32[8,256], index: 2, kind: input, shape index: {}]   ;;  %s817_s3 = inlined_call_operand.vmem [shape: f32[8,256], index: 3, kind: output, shape index: {0}]   ;;  %s818_s4 = inlined_call_operand.hbm [shape: f32[1,16], index: 4, kind: output, shape index: {1}]  }
   0x1   :  { %v622_v0 = vld [vmem:[%s816_s2] sm:$0xff]  ;;  %v627_v1 = vld [vmem:[%s816_s2 + $0x8] sm:$0xff]  ;;  %v25_v2 = vld [vmem:[%s815_s1 + $0x38] sm:$0xff]  ;;  %s587_s30 = smov 112  }
   0x2   :  { %308 = vrot.lane.b32.xlu1 %v622_v0, %s585_s21  ;;  %271 = vst [vmem:[#allocation2 + $0x8] sm:$0xf] %v622_v0  ;;  %360 = vrot.lane.b32.xlu0 %v622_v0, %s586_s22  ;;  %v26_v3 = vld [vmem:[%s815_s1 + $0x40] sm:$0xff]  ;;  %v20_v4 = vld [vmem:[%s815_s1 + $0x10] sm:$0xff] }
   0x3   :  { %272 = vst [vmem:[#allocation2 + $0x88] sm:$0xf] %v627_v1  ;;  %101 = vmatpush.msra.mxu2 %v25_v2  ;;  %121 = vmatpush.msra.mxu3 %v26_v3  ;;  %v21_v5 = vld [vmem:[%s815_s1 + $0x18] sm:$0xff]  ;;  %v23_v6 = vld [vmem:[%s815_s1 + $0x28] sm:$0xff]  ;;  %v17_v7 = vld [vmem:[%s814_s0] sm:$0x1] }
   0x4   :  { %335 = vrot.lane.b32.xlu2 %v622_v0, %s587_s30  ;;  %61 = vmatpush.msra.mxu0 %v23_v6  ;;  %v24_v8 = vld [vmem:[%s815_s1 + $0x30] sm:$0xff]  ;;  %v18_v9 = vld [vmem:[%s815_s1] sm:$0xff] }
   0x5   :  { %102 = vmatpush.msra.mxu2 %v20_v4  ;;  %122 = vmatpush.msra.mxu3 %v21_v5 }
   0x6   :  { %10 = vsyncpa [#allocation5], 0  ;;  %539 = vmatmul.msk.f32.vlgmr.msra.gmra.mxu2 %vm43_vm0, %v17_v7  ;;  %540 = vmatmul.msk.f32.vlgmr.msra.gmra.mxu3 %vm43_vm0, %v17_v7  ;;  %v19_v10 = vld [vmem:[%s815_s1 + $0x8] sm:$0xff]  ;;  %s588_s0 = smov 15   ;;  %s589_s13 = smov 127   ;;  %v156_v11 = vlaneseq  ;;  %v22_v22 = vld [vmem:[%s815_s1 + $0x20] sm:$0xff] }
   0x7   :  { %81 = vmatpush.msra.mxu1 %v24_v8  ;;  %62 = vmatpush.msra.mxu0 %v18_v9  ;;  %s590_s14 = smov 17   ;;  %s591_s15 = smov 1   ;;  %v27_v21 = vld [vmem:[%s815_s1 + $0x48] sm:$0xff]  ;;  %v275_v23 = vrot.slane %v622_v0, 4  ;;  %v276_v24 = vrot.slane %v627_v1, 4 }
   0x8   :  { %537 = vmatmul.msk.f32.vlgmr.msra.gmra.mxu0 %vm43_vm0, %v17_v7  ;;  %s592_s16 = smov 16   ;;  %v678_v12 = vand.u32 127, %v156_v11  ;;  %v535_v46 = vld [vmem:[%s815_s1 + $0x50] ss:$8 sm:$0xf]  ;;  %s524_s27 = sshll.u32 %s818_s4, 4  ;;  %s525_s27 = int_to_ptr.hbm [resolvable:$true] %s524_s27 }
   0x9   :  { %82 = vmatpush.msra.mxu1 %v19_v10  ;;  %141 = vmatpush.msrb.mxu0 %v27_v21  ;;  %279 = vst [vmem:[#allocation2 + $0x28] sm:$0xf] %v275_v23  ;;  %v536_v48 = vld [vmem:[%s815_s1 + $0x50] ss:$8 sm:$0x10]  ;;  %s593_s1 = smov [#allocation4]  }
   0xa   :  { %310 = vrot.lane.b32.xlu1 %v627_v1, %s585_s21  ;;  %362 = vrot.lane.b32.xlu0 %v627_v1, %s586_s22  ;;  %v681_v14 = vadd.s32 128, %v678_v12  ;;  %vm339_vm1 = vcmp.lt.s32.totalorder %v678_v12, 112  ;;  %280 = vst [vmem:[#allocation2 + $0x40] sm:$0xf] %v276_v24  ;;  %v159_v28 = vand.u32 15, %v678_v12  ;;  %vm312_vm7 = vcmp.lt.s32.totalorder %v678_v12, 113 }
   0xb   :  { %538 = vmatmul.msk.f32.vlgmr.msra.gmra.mxu1 %vm43_vm0, %v17_v7  ;;  %142 = vmatpush.msrb.mxu0 %v22_v22  ;;  %vm364_vm8 = vcmp.lt.s32.totalorder %v678_v12, 111  ;;  %vm224_vm13 = vcmp.ge.s32.totalorder %v678_v12, 15  ;;  %vm219_vm14 = vcmp.lt.s32.totalorder %v678_v12, 15  ;;  %v734_v50 = vor.u32 %v536_v48, %v535_v46  ;;  %s522_s25 = sshll.u32 %s593_s1, 4  ;;  %s523_s25 = int_to_ptr.vmem [resolvable:$true] %s522_s25 }
   0xc   :  { %337 = vrot.lane.b32.xlu2 %v627_v1, %s587_s30  ;;  %vm343_vm2 = vcmp.le.s32.totalorder %v681_v14, 239  ;;  %v160_v27 = vand.u32 15, %v681_v14  ;;  %vm316_vm4 = vcmp.le.s32.totalorder %v681_v14, 240  ;;  %vm368_vm6 = vcmp.le.s32.totalorder %v681_v14, 238 }
   0xd   :  { %vm708_vm9 = vcmp.ge.s32.totalorder %v159_v28, 1  ;;  %vm714_vm11 = vcmp.le.s32.totalorder %v159_v28, 14  ;;  %v33_v53 = vperm.slane %v734_v50, 0  ;;  %v34_v57 = vperm.slane %v734_v50, 1 }
   0xe   :  { %vm696_vm3 = vcmp.ge.s32.totalorder %v160_v27, 1  ;;  %vm701_vm5 = vcmp.le.s32.totalorder %v160_v27, 14  ;;  %vm226_vm15 = vmand %vm714_vm11, %vm224_vm13  ;;  %v35_v60 = vperm.slane %v734_v50, 2  ;;  %v36_v61 = vperm.slane %v734_v50, 3 }
   0xf   :  { %vm318_vm10 = vmand %vm696_vm3, %vm316_vm4  ;;  %vm170_vm4 = vcmp.ge.s32.totalorder %v678_v12, 17  ;;  %vm197_vm13 = vcmp.ge.s32.totalorder %v678_v12, 16 }
  0x10   :  { %541 = vmatmul.msk.f32.vlgmr.msrb.gmra.mxu0 %vm43_vm0, %v17_v7  ;;  %vm370_vm12 = vmand %vm701_vm5, %vm368_vm6  ;;  %vm412_vm0 = vcmask 1043456   ;;  %vm285_vm6 = vcmp.lt.s32.totalorder %v678_v12, 127 }
  0x12   :  { %217 = vrot.lane.b32.xlu1 %v627_v1, %s588_s0  ;;  %215 = vrot.lane.b32.xlu0 %v622_v0, %s588_s0 }
  0x14   :  { %281 = vrot.lane.b32.xlu2 %v622_v0, %s589_s13 }
  0x1a   :  { %161 = vrot.lane.b32.xlu1 %v622_v0, %s590_s14  ;;  %283 = vrot.lane.b32.xlu0 %v627_v1, %s589_s13 }
  0x1c   :  { %163 = vrot.lane.b32.xlu2 %v627_v1, %s590_s14 }
  0x22   :  { %246 = vrot.lane.b32.xlu1 %v627_v1, %s591_s15  ;;  %244 = vrot.lane.b32.xlu0 %v622_v0, %s591_s15 }
  0x24   :  { %190 = vrot.lane.b32.xlu2 %v622_v0, %s592_s16 }
  0x2a   :  { %192 = vrot.lane.b32.xlu0 %v627_v1, %s592_s16 }
  0x5e   :  { %v336_v13 = vpop.permute.xlu2 %335 }
  0x66   :  { %v338_v15 = vpop.permute.xlu2 %337 }
  0x67   :  { %v340_v16 = vsel %vm339_vm1, %v336_v13, %v338_v15  ;;  %v341_v17 = vsel %vm339_vm1, %v338_v15, %v336_v13  ;;  %vm289_vm1 = vcmp.le.s32.totalorder %v681_v14, 254 }
  0x68   :  { %v349_v18 = vsel %vm343_vm2, %v341_v17, 0.0  ;;  %v352_v19 = vrot.slane %v340_v16, 4  ;;  %358 = vst [vmem:[#allocation2 + $0x98] sm:$0xf0] %v340_v16  ;;  %vm149_vm2 = vcmask 286720  }
  0x69   :  { %v353_v20 = vrot.slane %v349_v18, 4  ;;  %359 = vst [vmem:[#allocation2 + $0x60] sm:$0xf0] %v349_v18 }
  0x6a   :  { %356 = vst [vmem:[#allocation2 + $0x58] sm:$0xf0] %v352_v19 }
  0x6b   :  { %357 = vst [vmem:[#allocation2 + $0x10] sm:$0xf0] %v353_v20 }
  0x6e   :  { %v725_v45 = vpop.permute.xlu2 %281 }
  0x74   :  { %v309_v25 = vpop.permute.xlu1 %308  ;;  %v361_v26 = vpop.permute.xlu0 %360 }
  0x76   :  { %v164_v6 = vpop.permute.xlu2 %163 }
  0x7c   :  { %v311_v33 = vpop.permute.xlu1 %310  ;;  %v363_v34 = vpop.permute.xlu0 %362 }
  0x7d   :  { %v313_v35 = vsel %vm312_vm7, %v309_v25, %v311_v33  ;;  %v314_v36 = vsel %vm312_vm7, %v311_v33, %v309_v25  ;;  %v365_v37 = vsel %vm364_vm8, %v361_v26, %v363_v34  ;;  %v366_v38 = vsel %vm364_vm8, %v363_v34, %v361_v26  ;;  %vm753_vm8 = vmand %vm701_vm5, %vm289_vm1 }
  0x7e   :  { %v323_v39 = vsel %vm708_vm9, %v313_v35, 0.0  ;;  %v324_v40 = vsel %vm318_vm10, %v314_v36, 0.0  ;;  %v375_v41 = vsel %vm714_vm11, %v365_v37, 0.0  ;;  %v376_v44 = vsel %vm370_vm12, %v366_v38, 0.0  ;;  %vm763_vm10 = vmand %vm708_vm9, %vm170_vm4  ;;  %v191_v46 = vpop.permute.xlu2 %190 }
  0x7f   :  { %325 = vst [vmem:[#allocation2 + $0x58] sm:$0xf] %v323_v39  ;;  %v329_v42 = vrot.slane %v323_v39, 4  ;;  %v330_v43 = vrot.slane %v324_v40, 4  ;;  %v381_v47 = vrot.slane %v375_v41, 4  ;;  %v382_v49 = vrot.slane %v376_v44, 4 }
  0x80   :  { %326 = vst [vmem:[#allocation2 + $0x10] sm:$0xf] %v324_v40  ;;  %vm165_vm7 = vcmp.lt.s32.totalorder %v678_v12, 17 }
  0x81   :  { %333 = vst [vmem:[#allocation2 + $0x98] sm:$0xf] %v329_v42 }
  0x82   :  { %334 = vst [vmem:[#allocation2 + $0x60] sm:$0xf] %v330_v43 }
  0x83   :  { %377 = vst [vmem:[#allocation2 + $0x20] sm:$0xf] %v375_v41 }
  0x84   :  { %378 = vst [vmem:[#allocation2 + $0x48] sm:$0xf] %v376_v44  ;;  %v218_v51 = vpop.permute.xlu1 %217  ;;  %v216_v52 = vpop.permute.xlu0 %215 }
  0x85   :  { %385 = vst [vmem:[#allocation2 + $0x70] sm:$0xf] %v381_v47  ;;  %v220_v54 = vsel %vm219_vm14, %v216_v52, %v218_v51  ;;  %v221_v55 = vsel %vm219_vm14, %v218_v51, %v216_v52  ;;  %v64_v56 = vpop.f32.mrf.mxu0  ;;  %vm147_vm14 = vcmask 122880  }
  0x86   :  { %386 = vst [vmem:[#allocation2 + $0x90] sm:$0xf] %v382_v49  ;;  %v232_v58 = vsel %vm226_vm15, %v221_v55, 0.0  ;;  %v233_v59 = vsel %vm701_vm5, %v220_v54, 0.0  ;;  %v65_v0 = vadd.f32 %v64_v56, %v33_v53  ;;  %v400_v11 = vld [vmem:[#allocation2 + $0x58] sm:$0xff]  ;;  %vm251_vm5 = vcmp.ge.s32.totalorder %v678_v12, 1 }
  0x87   :  { %234 = vst [vmem:[#allocation2 + $0x30] sm:$0xf] %v232_v58  ;;  %v238_v62 = vrot.slane %v232_v58, 4  ;;  %v239_v63 = vrot.slane %v233_v59, 4  ;;  %v401_v17 = vld [vmem:[#allocation2 + $0x10] sm:$0xff]  ;;  %vm253_vm12 = vmand %vm708_vm9, %vm251_vm5  ;;  %vm194_vm9 = vcmp.lt.s32.totalorder %v678_v12, 16 }
  0x88   :  { %235 = vst [vmem:[#allocation2 + $0x68] sm:$0xf] %v233_v59  ;;  %v84_v1 = vpop.f32.mrf.mxu1  ;;  %v402_v22 = vld [vmem:[#allocation2 + $0x98] sm:$0xff] }
  0x89   :  { %242 = vst [vmem:[#allocation2 + $0x78] sm:$0xf] %v238_v62  ;;  %v85_v2 = vadd.f32 %v84_v1, %v34_v57  ;;  %v104_v3 = vpop.f32.mrf.mxu2  ;;  %v124_v4 = vpop.f32.mrf.mxu3  ;;  %v403_v23 = vld [vmem:[#allocation2 + $0x60] sm:$0xff] }
  0x8a   :  { %243 = vst [vmem:[#allocation2 + $0x80] sm:$0xf] %v239_v63  ;;  %v404_v5 = vld [vmem:[#allocation2 + $0x20] sm:$0xf]  ;;  %v105_v7 = vadd.f32 %v104_v3, %v35_v60  ;;  %v125_v8 = vadd.f32 %v124_v4, %v36_v61  ;;  %v37_v61 = vperm.slane %v734_v50, 4 }
  0x8b   :  { %542 = vmatpush.msk.msrb.mxu1 %vm412_vm0, %v404_v5  ;;  %v405_v9 = vld [vmem:[#allocation2 + $0x48] sm:$0xf]  ;;  %150 = vst.msk [vmem:[#allocation3] sm:$0x1] %vm149_vm2, %v65_v0 }
  0x8c   :  { %544 = vmatpush.msk.msrb.mxu2 %vm412_vm0, %v405_v9  ;;  %v406_v13 = vld [vmem:[#allocation2 + $0x70] sm:$0xf]  ;;  %v162_v15 = vpop.permute.xlu1 %161  ;;  %v284_v16 = vpop.permute.xlu0 %283  ;;  %151 = vst.msk [vmem:[#allocation3 + $0x1] sm:$0x1] %vm149_vm2, %v85_v2 }
  0x8d   :  { %437 = vmatpush.msrb.mxu1 %v400_v11  ;;  %546 = vmatpush.msk.msrb.mxu3 %vm412_vm0, %v406_v13  ;;  %v407_v18 = vld [vmem:[#allocation2 + $0x90] sm:$0xf]  ;;  %v286_v19 = vsel %vm285_vm6, %v725_v45, %v284_v16  ;;  %v287_v20 = vsel %vm285_vm6, %v284_v16, %v725_v45  ;;  %v166_v21 = vsel %vm165_vm7, %v162_v15, %v164_v6  ;;  %v144_v62 = vpop.f32.mrf.mxu0 }
  0x8e   :  { %152 = vst.msk [vmem:[#allocation3 + $0x2] sm:$0x1] %vm149_vm2, %v105_v7  ;;  %457 = vmatpush.msrb.mxu2 %v401_v17  ;;  %548 = vmatpush.msk.msra.mxu0 %vm412_vm0, %v407_v18  ;;  %v296_v24 = vsel %vm714_vm11, %v286_v19, 0.0  ;;  %v297_v25 = vsel %vm753_vm8, %v287_v20, 0.0  ;;  %v167_v26 = vsel %vm165_vm7, %v164_v6, %v162_v15  ;;  %v179_v33 = vsel %vm696_vm3, %v166_v21, 0.0 }
  0x8f   :  { %153 = vst.msk [vmem:[#allocation3 + $0x3] sm:$0x1] %vm149_vm2, %v125_v8  ;;  %477 = vmatpush.msrb.mxu3 %v402_v22  ;;  %v300_v27 = vrot.slane %v296_v24, 4  ;;  %v301_v28 = vrot.slane %v297_v25, 4  ;;  %v178_v30 = vsel %vm763_vm10, %v167_v26, 0.0  ;;  %v185_v34 = vrot.slane %v179_v33, 4 }
  0x90   :  { %306 = vst [vmem:[#allocation2 + $0x28] sm:$0xf0] %v296_v24  ;;  %497 = vmatpush.msra.mxu0 %v403_v23  ;;  %v184_v32 = vrot.slane %v178_v30, 4  ;;  %vm248_vm11 = vcmp.lt.s32.totalorder %v678_v12, 1  ;;  %v145_v63 = vadd.f32 %v144_v62, %v37_v61 }
  0x91   :  { %307 = vst [vmem:[#allocation2 + $0x40] sm:$0xf0] %v297_v25 }
  0x92   :  { %304 = vst [vmem:[#allocation2 + $0x8] sm:$0xf0] %v300_v27 }
  0x93   :  { %305 = vst [vmem:[#allocation2 + $0x88] sm:$0xf0] %v301_v28 }
  0x94   :  { %180 = vst [vmem:[#allocation2] sm:$0xf] %v178_v30  ;;  %v247_v35 = vpop.permute.xlu1 %246  ;;  %v245_v36 = vpop.permute.xlu0 %244 }
  0x95   :  { %181 = vst [vmem:[#allocation2 + $0x38] sm:$0xf] %v179_v33  ;;  %v249_v37 = vsel %vm248_vm11, %v245_v36, %v247_v35  ;;  %v250_v38 = vsel %vm248_vm11, %v247_v35, %v245_v36 }
  0x96   :  { %188 = vst [vmem:[#allocation2 + $0x50] sm:$0xf] %v184_v32  ;;  %v259_v39 = vsel %vm253_vm12, %v250_v38, 0.0  ;;  %v260_v40 = vsel %vm696_vm3, %v249_v37, 0.0  ;;  %v387_v57 = vld [vmem:[#allocation3] sm:$0xf] }
  0x97   :  { %189 = vst [vmem:[#allocation2 + $0x18] sm:$0xf] %v185_v34  ;;  %v398_v41 = vld [vmem:[#allocation2 + $0x28] sm:$0xff]  ;;  %v263_v42 = vrot.slane %v259_v39, 4  ;;  %v264_v43 = vrot.slane %v260_v40, 4  ;;  %vm408_vm3 = vcmask 293888  }
  0x98   :  { %269 = vst [vmem:[#allocation2 + $0x78] sm:$0xf0] %v259_v39  ;;  %478 = vmatpush.msrb.mxu3 %v398_v41  ;;  %v399_v44 = vld [vmem:[#allocation2 + $0x40] sm:$0xff] }
  0x99   :  { %270 = vst [vmem:[#allocation2 + $0x80] sm:$0xf0] %v260_v40  ;;  %498 = vmatpush.msra.mxu0 %v399_v44  ;;  %v396_v31 = vld [vmem:[#allocation2 + $0x8] sm:$0xff] }
  0x9a   :  { %267 = vst [vmem:[#allocation2 + $0x30] sm:$0xf0] %v263_v42  ;;  %438 = vmatpush.msrb.mxu1 %v396_v31  ;;  %v397_v45 = vld [vmem:[#allocation2 + $0x88] sm:$0xff] }
  0x9b   :  { %268 = vst [vmem:[#allocation2 + $0x68] sm:$0xf0] %v264_v43  ;;  %458 = vmatpush.msrb.mxu2 %v397_v45 }
  0x9c   :  { %v193_v29 = vpop.permute.xlu0 %192  ;;  %148 = vst.msk [vmem:[#allocation4] sm:$0x1] %vm147_vm14, %v145_v63 }
  0x9d   :  { %v195_v47 = vsel %vm194_vm9, %v191_v46, %v193_v29  ;;  %v196_v48 = vsel %vm194_vm9, %v193_v29, %v191_v46  ;;  %527 = dma.vmem_to_hbm [thread:$0]  %s523_s25, 16, %s525_s27, [#allocation5]  }
  0x9e   :  { %v203_v49 = vsel %vm197_vm13, %v196_v48, 0.0  ;;  %v208_v51 = vrot.slane %v195_v47, 4  ;;  %214 = vst [vmem:[#allocation2 + $0x18] sm:$0xf0] %v195_v47 }
  0x9f   :  { %v394_v52 = vld [vmem:[#allocation2 + $0x78] sm:$0xff]  ;;  %v207_v53 = vrot.slane %v203_v49, 4  ;;  %213 = vst [vmem:[#allocation2 + $0x50] sm:$0xf0] %v203_v49 }
  0xa0   :  { %479 = vmatpush.msrb.mxu3 %v394_v52  ;;  %v395_v54 = vld [vmem:[#allocation2 + $0x80] sm:$0xff]  ;;  %212 = vst [vmem:[#allocation2 + $0x38] sm:$0xf0] %v208_v51 }
  0xa1   :  { %499 = vmatpush.msra.mxu0 %v395_v54  ;;  %v392_v55 = vld [vmem:[#allocation2 + $0x30] sm:$0xff]  ;;  %211 = vst [vmem:[#allocation2] sm:$0xf0] %v207_v53 }
  0xa2   :  { %439 = vmatpush.msrb.mxu1 %v392_v55  ;;  %v393_v56 = vld [vmem:[#allocation2 + $0x68] sm:$0xff] }
  0xa3   :  { %459 = vmatpush.msrb.mxu2 %v393_v56 }
  0xa5   :  { %v391_v12 = vld [vmem:[#allocation2 + $0x18] sm:$0xff] }
  0xa6   :  { %500 = vmatpush.msra.mxu0 %v391_v12  ;;  %v390_v58 = vld [vmem:[#allocation2 + $0x50] sm:$0xff] }
  0xa7   :  { %480 = vmatpush.msrb.mxu3 %v390_v58  ;;  %v389_v59 = vld [vmem:[#allocation2 + $0x38] sm:$0xff]  ;;  %549 = vmatmul.msk.f32.vlgmr.msra.gmra.mxu0 %vm408_vm3, %v387_v57 }
  0xa8   :  { %460 = vmatpush.msrb.mxu2 %v389_v59  ;;  %547 = vmatmul.msk.f32.vlgmr.msrb.gmra.mxu3 %vm408_vm3, %v387_v57  ;;  %v388_v60 = vld [vmem:[#allocation2] sm:$0xff] }
  0xa9   :  { %440 = vmatpush.msrb.mxu1 %v388_v60  ;;  %545 = vmatmul.msk.f32.vlgmr.msrb.gmra.mxu2 %vm408_vm3, %v387_v57 }
  0xaa   :  { %543 = vmatmul.msk.f32.vlgmr.msrb.gmra.mxu1 %vm408_vm3, %v387_v57 }
 0x124   :  { %v502_v0 = vpop.f32.mrf.mxu0 }
 0x125   :  { %v510_v1 = vrot.slane %v502_v0, 4 }
 0x127   :  { %514 = vst [vmem:[%s817_s3 + $0x8] sm:$0xf0] %v510_v1  ;;  %v442_v50 = vpop.f32.mrf.mxu1 }
 0x128   :  { %505 = vst [vmem:[%s817_s3] sm:$0xf] %v442_v50 }
 0x12b   :  { %v482_v2 = vpop.f32.mrf.mxu3 }
 0x12c   :  { %v509_v3 = vrot.slane %v482_v2, 4  ;;  %v462_v4 = vpop.f32.mrf.mxu2 }
 0x12d   :  { %506 = vst [vmem:[%s817_s3 + $0x8] sm:$0xf] %v462_v4 }
 0x12e   :  { %513 = vst [vmem:[%s817_s3] sm:$0xf0] %v509_v3 }
 0x12f   :  { %583 = dma.done.wait [#allocation5], 16  }
 0x130   :  { %584 = vsyncadd [#allocation5], 4294967280 }
 0x131   :  { %534 = vsyncpa [#allocation5], 1 }

</bundles_post_ra>
